<compile_context>
chip_gen: v7x
topology: tpu7x:2x2x1
jax: 0.10.0
libtpu: 0.0.40
codegen_flags: <defaults>
</compile_context>

<pallas_src>
import functools

import jax
import jax.numpy as jnp
from jax.experimental import pallas as pl
from jax.experimental.pallas import tpu as pltpu

EPS = 1e-5
LANE = 128
MAX_TM = 512          # row tile (multiple of 256 for v6e/v7x MXU, 128 for v5e)


def _round_up(x, m):
    return ((x + m - 1) // m) * m


def _vmem_limit(buffer_bytes):
    """Scoped-VMEM request sized from the real pipeline buffers, with headroom
    for Mosaic internal scratch, kept well under v7x's 64 MiB per-core VMEM."""
    return int(min(max(int(buffer_bytes * 1.25) + (4 << 20), 24 << 20), 60 << 20))


# ---------------------------------------------------------------------------
# Kernel 1: fused [prev-layer BN affine + ReLU] -> Linear (bf16 MXU, f32 acc)
#           + per-tile partial per-channel sum / sum-of-squares (batch-stat BN).
# ---------------------------------------------------------------------------
def _linear_bn_stats_kernel(*refs, prev_bn_relu, tm, m_true, mask_rows):
    if prev_bn_relu:
        a_ref, w_ref, scale_ref, shift_ref, y_ref, psum_ref, psq_ref = refs
    else:
        a_ref, w_ref, y_ref, psum_ref, psq_ref = refs

    i = pl.program_id(0)

    if prev_bn_relu:
        # Previous layer's BN folded into (scale, shift) + its ReLU, fused here.
        a = a_ref[...].astype(jnp.float32)
        a = jnp.maximum(a * scale_ref[...] + shift_ref[...], 0.0)
        a_mat = a.astype(jnp.bfloat16)
    else:
        a_mat = a_ref[...].astype(jnp.bfloat16)

    # MXU matmul: bf16 operands, f32 accumulation.  No bias: it cancels in the
    # downstream batch-stat BatchNorm (mean subtraction).
    y = jnp.dot(a_mat, w_ref[...], preferred_element_type=jnp.float32)

    # Store activations in bf16 (halves HBM write + next layer's read).
    y_ref[...] = y.astype(y_ref.dtype)

    # Per-tile partial statistics from the f32 accumulator (pre-cast).
    psum_ref[...] = jnp.sum(y, axis=0, keepdims=True)[None]
    psq_ref[...] = jnp.sum(y * y, axis=0, keepdims=True)[None]

    if mask_rows:
        # Only the last tile can contain padded rows; redo its stats masked.
        @pl.when(i == pl.num_programs(0) - 1)
        def _():
            rid = i * tm + jax.lax.broadcasted_iota(jnp.int32, (tm, 1), 0)
            ym = jnp.where(rid < m_true, y, 0.0)
            psum_ref[...] = jnp.sum(ym, axis=0, keepdims=True)[None]
            psq_ref[...] = jnp.sum(ym * ym, axis=0, keepdims=True)[None]


def _linear_bn_stats(a, w, scale_prev, shift_prev, *, tm, m_true):
    mp, kp = a.shape
    cp = w.shape[1]
    ntiles = mp // tm
    prev_bn_relu = scale_prev is not None
    mask_rows = (mp != m_true)

    kern = functools.partial(_linear_bn_stats_kernel,
                             prev_bn_relu=prev_bn_relu, tm=tm,
                             m_true=m_true, mask_rows=mask_rows)

    in_specs = [
        pl.BlockSpec((tm, kp), lambda i: (i, 0)),    # activation tile
        pl.BlockSpec((kp, cp), lambda i: (0, 0)),    # weight (grid-invariant)
    ]
    args = [a, w]
    if prev_bn_relu:
        in_specs += [
            pl.BlockSpec((1, kp), lambda i: (0, 0)),  # prev BN scale
            pl.BlockSpec((1, kp), lambda i: (0, 0)),  # prev BN shift
        ]
        args += [scale_prev, shift_prev]

    # Pipeline buffer accounting (double-buffered streaming operands).
    buf_bytes = (2 * tm * kp * a.dtype.itemsize      # A
                 + 2 * kp * cp * 2                   # weight (bf16)
                 + 2 * tm * cp * 2                   # Y (bf16)
                 + 4 * 2 * cp * 4                    # psum/psq
                 + 4 * kp * 4)                       # scale/shift

    return pl.pallas_call(
        kern,
        grid=(ntiles,),
        in_specs=in_specs,
        out_specs=[
            pl.BlockSpec((tm, cp), lambda i: (i, 0)),       # pre-BN activation
            pl.BlockSpec((1, 1, cp), lambda i: (i, 0, 0)),  # partial sum
            pl.BlockSpec((1, 1, cp), lambda i: (i, 0, 0)),  # partial sum of sq
        ],
        out_shape=[
            jax.ShapeDtypeStruct((mp, cp), jnp.bfloat16),
            jax.ShapeDtypeStruct((ntiles, 1, cp), jnp.float32),
            jax.ShapeDtypeStruct((ntiles, 1, cp), jnp.float32),
        ],
        compiler_params=pltpu.CompilerParams(
            dimension_semantics=("parallel",),    # no cross-step carry anymore
            vmem_limit_bytes=_vmem_limit(buf_bytes)),
    )(*args)


# ---------------------------------------------------------------------------
# Kernel 2: final folded BN affine (layer3 has no ReLU).  bf16 in, f32 out.
# ---------------------------------------------------------------------------
def _bn_affine_kernel(y_ref, scale_ref, shift_ref, o_ref):
    o_ref[...] = y_ref[...].astype(jnp.float32) * scale_ref[...] + shift_ref[...]


def _bn_affine(y, scale, shift, *, tm):
    mp, cp = y.shape
    buf_bytes = 2 * tm * cp * (y.dtype.itemsize + 4) + 4 * cp * 4
    return pl.pallas_call(
        _bn_affine_kernel,
        grid=(mp // tm,),
        in_specs=[
            pl.BlockSpec((tm, cp), lambda i: (i, 0)),
            pl.BlockSpec((1, cp), lambda i: (0, 0)),
            pl.BlockSpec((1, cp), lambda i: (0, 0)),
        ],
        out_specs=pl.BlockSpec((tm, cp), lambda i: (i, 0)),
        out_shape=jax.ShapeDtypeStruct((mp, cp), jnp.float32),
        compiler_params=pltpu.CompilerParams(
            dimension_semantics=("parallel",),
            vmem_limit_bytes=_vmem_limit(buf_bytes)),
    )(y, scale, shift)


def _fold_bn(psum_parts, psq_parts, m_true, gamma, beta, eps=EPS):
    """Combine per-tile partial sums and fold batch-stat BN into per-channel
    (scale, shift); all f32 glue (negligible cost)."""
    s = jnp.sum(psum_parts, axis=(0, 1))          # (cp,)
    q = jnp.sum(psq_parts, axis=(0, 1))
    mean = s / m_true
    var = jnp.maximum(q / m_true - mean * mean, 0.0)
    scale = gamma * jax.lax.rsqrt(var + eps)      # (1, cp)
    shift = beta - mean * scale                   # (1, cp)
    return scale, shift


# ---------------------------------------------------------------------------
# Parameters (torch layout) + one-time preparation for the kernels
# ---------------------------------------------------------------------------
def make_params(key, in_dim, hidden_dim, out_dim):
    ks = jax.random.split(key, 6)

    def lin(kw, kb, fan_in, fan_out):
        bound = 1.0 / (fan_in ** 0.5)
        w = jax.random.uniform(kw, (fan_out, fan_in), jnp.float32, -bound, bound)
        b = jax.random.uniform(kb, (fan_out,), jnp.float32, -bound, bound)
        return w, b

    w1, b1 = lin(ks[0], ks[1], in_dim, hidden_dim)
    w2, b2 = lin(ks[2], ks[3], hidden_dim, hidden_dim)
    w3, b3 = lin(ks[4], ks[5], hidden_dim, out_dim)
    return {
        "w1": w1, "b1": b1,
        "g1": jnp.ones((hidden_dim,), jnp.float32), "be1": jnp.zeros((hidden_dim,), jnp.float32),
        "w2": w2, "b2": b2,
        "g2": jnp.ones((hidden_dim,), jnp.float32), "be2": jnp.zeros((hidden_dim,), jnp.float32),
        "w3": w3, "b3": b3,
        "g3": jnp.ones((out_dim,), jnp.float32), "be3": jnp.zeros((out_dim,), jnp.float32),
    }


def prepare_params(p, in_dim, hidden_dim, out_dim):
    """Pre-transpose to (K, C) bf16 and zero-pad feature dims to multiples of
    128, once, outside the per-forward hot path.  Linear biases are dropped
    (they cancel exactly in the batch-stat BatchNorm).  Padded gamma/beta are
    0.0 so padded channels fold to scale=0 / shift=0."""
    kp = _round_up(in_dim, LANE)
    hp = _round_up(hidden_dim, LANE)
    op = _round_up(out_dim, LANE)

    def pad_w(w_torch, k, kpad, c, cpad):      # torch (c, k) -> (kpad, cpad) bf16
        w = jnp.zeros((kpad, cpad), jnp.float32).at[:k, :c].set(w_torch.T)
        return w.astype(jnp.bfloat16)

    def pad_vec(v, c, cpad):
        return jnp.zeros((1, cpad), jnp.float32).at[0, :c].set(v)

    return {
        "dims": (in_dim, hidden_dim, out_dim, kp, hp, op),
        "w1": pad_w(p["w1"], in_dim, kp, hidden_dim, hp),
        "g1": pad_vec(p["g1"], hidden_dim, hp), "be1": pad_vec(p["be1"], hidden_dim, hp),
        "w2": pad_w(p["w2"], hidden_dim, hp, hidden_dim, hp),
        "g2": pad_vec(p["g2"], hidden_dim, hp), "be2": pad_vec(p["be2"], hidden_dim, hp),
        "w3": pad_w(p["w3"], hidden_dim, hp, out_dim, op),
        "g3": pad_vec(p["g3"], out_dim, op), "be3": pad_vec(p["be3"], out_dim, op),
    }


# ---------------------------------------------------------------------------
# projection_MLP forward (training-mode BN: batch statistics)
# ---------------------------------------------------------------------------
def projection_mlp_forward(x, prep, num_layers=3):
    in_dim, hidden_dim, out_dim, kp, hp, op = prep["dims"]
    m = x.shape[0]
    tm = min(MAX_TM, _round_up(m, 8))
    mp = _round_up(m, tm)

    if m == mp and in_dim == kp:
        a0 = x                               # no extra padding pass needed
    else:
        a0 = jnp.zeros((mp, kp), jnp.bfloat16).at[:m, :in_dim].set(
            x.astype(jnp.bfloat16))

    # layer1 Linear (+ partial stats for its BN; BN+ReLU fused into next kernel)
    y1, s1, q1 = _linear_bn_stats(a0, prep["w1"], None, None, tm=tm, m_true=m)
    sc1, sh1 = _fold_bn(s1, q1, m, prep["g1"], prep["be1"])

    if num_layers == 3:
        y2, s2, q2 = _linear_bn_stats(y1, prep["w2"], sc1, sh1, tm=tm, m_true=m)
        sc2, sh2 = _fold_bn(s2, q2, m, prep["g2"], prep["be2"])
        y3, s3, q3 = _linear_bn_stats(y2, prep["w3"], sc2, sh2, tm=tm, m_true=m)
        sc3, sh3 = _fold_bn(s3, q3, m, prep["g3"], prep["be3"])
    elif num_layers == 2:
        y3, s3, q3 = _linear_bn_stats(y1, prep["w3"], sc1, sh1, tm=tm, m_true=m)
        sc3, sh3 = _fold_bn(s3, q3, m, prep["g3"], prep["be3"])
    else:
        raise Exception("num_layers must be 2 or 3")

    out = _bn_affine(y3, sc3, sh3, tm=tm)    # layer3 BN, no ReLU
    return out[:m, :out_dim]


# ---------------------------------------------------------------------------
# Pure-JAX reference (f32, with Linear biases) for a sanity check
# ---------------------------------------------------------------------------
def projection_mlp_ref(x, p, num_layers=3, eps=EPS):
    def block(h, w, b, g, be, relu):
        y = h @ w.T + b
        mean = y.mean(axis=0)
        var = jnp.mean((y - mean) ** 2, axis=0)
        yn = (y - mean) * jax.lax.rsqrt(var + eps) * g + be
        return jnp.maximum(yn, 0.0) if relu else yn

    h = block(x, p["w1"], p["b1"], p["g1"], p["be1"], True)
    if num_layers == 3:
        h = block(h, p["w2"], p["b2"], p["g2"], p["be2"], True)
    h = block(h, p["w3"], p["b3"], p["g3"], p["be3"], False)
    return h


if __name__ == "__main__":
    in_dim, hidden_dim, out_dim = 32, 32, 32   # layer3 BN requires out_dim == hidden_dim
    key = jax.random.PRNGKey(0)
    kx, kp_ = jax.random.split(key)

    raw = make_params(kp_, in_dim, hidden_dim, out_dim)
    prep = prepare_params(raw, in_dim, hidden_dim, out_dim)

    # Exercise both the no-padding path (B=16) and the masked-last-tile path (B=12).
    for B in (16, 12):
        x = jax.random.normal(jax.random.fold_in(kx, B), (B, in_dim), jnp.float32)
        out = jax.block_until_ready(projection_mlp_forward(x, prep, num_layers=3))
        ref = jax.block_until_ready(projection_mlp_ref(x, raw, num_layers=3))
        assert out.shape == ref.shape == (B, out_dim)
        err = float(jnp.max(jnp.abs(out - ref)))
        assert jnp.allclose(out, ref, atol=6e-2, rtol=6e-2), \
            f"B={B}: max abs err {err}"

    print("KERNEL_OK")
</pallas_src>

<mosaic_0001>
module attributes {stable_mosaic.version = 11 : i64} {
  func.func @_linear_bn_stats_kernel(%arg0: i32, %arg1: memref<16x128xbf16, #tpu.memory_space<vmem>>, %arg2: memref<128x128xbf16, #tpu.memory_space<vmem>>, %arg3: memref<16x128xbf16, #tpu.memory_space<vmem>>, %arg4: memref<1x1x128xf32, #tpu.memory_space<vmem>>, %arg5: memref<1x1x128xf32, #tpu.memory_space<vmem>>) attributes {dimension_semantics = [#tpu.dimension_semantics<parallel>], iteration_bounds = array<i64: 1>, scalar_prefetch = 0 : i64, scratch_operands = 0 : i64, tpu.core_type = #tpu.core_type<tc>, window_params = [{transform_indices = @transform_0, window_bounds = array<i64: 16, 128>}, {pipeline_mode = #tpu.pipeline_mode<synchronous>, transform_indices = @transform_1, window_bounds = array<i64: 128, 128>}, {transform_indices = @transform_2, window_bounds = array<i64: 16, 128>}, {transform_indices = @transform_3, window_bounds = array<i64: 1, 1, 128>}, {transform_indices = @transform_4, window_bounds = array<i64: 1, 1, 128>}]} {
    %c0 = arith.constant 0 : index
    %c0_0 = arith.constant 0 : index
    %0 = vector.load %arg1[%c0, %c0_0] : memref<16x128xbf16, #tpu.memory_space<vmem>>, vector<16x128xbf16>
    %c0_1 = arith.constant 0 : index
    %c0_2 = arith.constant 0 : index
    %1 = vector.load %arg2[%c0_1, %c0_2] : memref<128x128xbf16, #tpu.memory_space<vmem>>, vector<128x128xbf16>
    %cst = arith.constant dense<0.000000e+00> : vector<16x128xf32>
    %2 = tpu.matmul %0, %1, %cst {dimension_numbers = #tpu.dot_dimension_numbers<[1], [0], [0], [1], [0, 0, 1, 1], [], []>} : vector<16x128xbf16>, vector<128x128xbf16>, vector<16x128xf32> -> vector<16x128xf32>
    %3 = arith.truncf %2 : vector<16x128xf32> to vector<16x128xbf16>
    %c0_3 = arith.constant 0 : index
    %c0_4 = arith.constant 0 : index
    %4 = vector.load %arg3[%c0_3, %c0_4] : memref<16x128xbf16, #tpu.memory_space<vmem>>, vector<16x128xbf16>
    tpu.vector_store %arg3[%c0_3, %c0_4], %3 {strides = array<i32>} : memref<16x128xbf16, #tpu.memory_space<vmem>>, vector<16x128xbf16>,
    %cst_5 = arith.constant dense<0.000000e+00> : vector<128xf32>
    %5 = vector.multi_reduction <add>, %2, %cst_5 [0] : vector<16x128xf32> to vector<128xf32>
    %6 = vector.shape_cast %5 : vector<128xf32> to vector<1x128xf32>
    %7 = vector.shape_cast %6 : vector<1x128xf32> to vector<1x1x128xf32>
    %c0_6 = arith.constant 0 : index
    %c0_7 = arith.constant 0 : index
    %c0_8 = arith.constant 0 : index
    %8 = vector.load %arg4[%c0_6, %c0_7, %c0_8] : memref<1x1x128xf32, #tpu.memory_space<vmem>>, vector<1x1x128xf32>
    tpu.vector_store %arg4[%c0_6, %c0_7, %c0_8], %7 {strides = array<i32>} : memref<1x1x128xf32, #tpu.memory_space<vmem>>, vector<1x1x128xf32>,
    %9 = arith.mulf %2, %2 : vector<16x128xf32>
    %cst_9 = arith.constant dense<0.000000e+00> : vector<128xf32>
    %10 = vector.multi_reduction <add>, %9, %cst_9 [0] : vector<16x128xf32> to vector<128xf32>
    %11 = vector.shape_cast %10 : vector<128xf32> to vector<1x128xf32>
    %12 = vector.shape_cast %11 : vector<1x128xf32> to vector<1x1x128xf32>
    %c0_10 = arith.constant 0 : index
    %c0_11 = arith.constant 0 : index
    %c0_12 = arith.constant 0 : index
    %13 = vector.load %arg5[%c0_10, %c0_11, %c0_12] : memref<1x1x128xf32, #tpu.memory_space<vmem>>, vector<1x1x128xf32>
    tpu.vector_store %arg5[%c0_10, %c0_11, %c0_12], %12 {strides = array<i32>} : memref<1x1x128xf32, #tpu.memory_space<vmem>>, vector<1x1x128xf32>,
    return
  }
  func.func @transform_0(%arg0: i32) -> (i32, i32) {
    %c0_i32 = arith.constant 0 : i32
    %c0_i32_0 = arith.constant 0 : i32
    return %arg0, %c0_i32 : i32, i32
  }
  func.func @transform_1(%arg0: i32) -> (i32, i32) {
    %c0_i32 = arith.constant 0 : i32
    %c0_i32_0 = arith.constant 0 : i32
    %c0_i32_1 = arith.constant 0 : i32
    return %c0_i32, %c0_i32_0 : i32, i32
  }
  func.func @transform_2(%arg0: i32) -> (i32, i32) {
    %c0_i32 = arith.constant 0 : i32
    %c0_i32_0 = arith.constant 0 : i32
    return %arg0, %c0_i32 : i32, i32
  }
  func.func @transform_3(%arg0: i32) -> (i32, i32, i32) {
    %c0_i32 = arith.constant 0 : i32
    %c0_i32_0 = arith.constant 0 : i32
    %c0_i32_1 = arith.constant 0 : i32
    return %arg0, %c0_i32, %c0_i32_0 : i32, i32, i32
  }
  func.func @transform_4(%arg0: i32) -> (i32, i32, i32) {
    %c0_i32 = arith.constant 0 : i32
    %c0_i32_0 = arith.constant 0 : i32
    %c0_i32_1 = arith.constant 0 : i32
    return %arg0, %c0_i32, %c0_i32_0 : i32, i32, i32
  }
}

</mosaic_0001>

<bundles_post_ra>
// kernel: tpu_custom_call.1
= control target key start
LH: loop header
LB: loop body
LE: loop exit
PB: predicated region body
PF: predicated region fallthrough
CT: control target
= control target key end

     0   :  { %10 = vsyncpa [#allocation3], 0  ;;  %s525_s0 = inlined_call_operand.hbm [shape: bf16[16,128], index: 0, kind: input, shape index: {}]   ;;  %s526_s1 = inlined_call_operand.hbm [shape: bf16[128,128], index: 1, kind: input, shape index: {}]   ;;  %s527_s2 = inlined_call_operand.hbm [shape: bf16[16,128], index: 2, kind: output, shape index: {0}]   ;;  %s528_s3 = inlined_call_operand.hbm [shape: f32[1,1,128], index: 3, kind: output, shape index: {1}]   ;;  %s529_s4 = inlined_call_operand.hbm [shape: f32[1,1,128], index: 4, kind: output, shape index: {2}]  }
   0x1   :  { %11 = vsyncpa [#allocation6], 0 }
   0x2   :  { %12 = vsyncpa [#allocation4], 0 }
   0x3   :  { %13 = vsyncpa [#allocation9], 0  ;;  %s414_s15 = smov [#allocation2]   ;;  %s296_s19 = scalar_lea.hbm %s525_s0, 128 }
   0x4   :  { %s19_s16 = sshll.u32 %s414_s15, 4  ;;  %p297_p0 = scmp.ne.s32.totalorder %s525_s0, %s296_s19  ;;  %s20_s16 = int_to_ptr.vmem [resolvable:$true] %s19_s16 }
   0x5   :  { %p300_p1 = scmp.lt.u32.totalorder %s296_s19, %s525_s0 }
   0x7   :  { %p302_p2 = pnand %p300_p1, %p297_p0 }
   0x9   :  { %305 = shalt.err (!%p302_p2)
}
   0xa   :  { %s306_s24 = scalar_lea.vmem %s20_s16, 128  ;;  %p311_p4 = scmp.lt.s32.totalorder %s20_s16, %s20_s16 }
   0xb   :  { %p307_p3 = scmp.ne.s32.totalorder %s20_s16, %s306_s24  ;;  %p312_p5 = scmp.lt.s32.totalorder %s306_s24, %s306_s24 }
   0xd   :  { %p313_p6 = por %p312_p5, %p311_p4 }
   0xf   :  { %p314_p7 = pnand %p313_p6, %p307_p3 }
  0x11   :  { %317 = shalt.err (!%p314_p7)
}
  0x12   :  { %s415_s25 = smov 64   ;;  %s416_s26 = smov 4  }
  0x13   :  { %25 = dma.hbm_to_vmem [thread:$0]  %s525_s0, 128, %s20_s16, [#allocation3], %s415_s25, %s415_s25, %s416_s26  }
  0x14   :  { %s417_s29 = smov [#allocation5]   ;;  %s318_s7 = scalar_lea.hbm %s526_s1, 1024 }
  0x15   :  { %s31_s30 = sshll.u32 %s417_s29, 4  ;;  %p319_p8 = scmp.ne.s32.totalorder %s526_s1, %s318_s7  ;;  %s32_s30 = int_to_ptr.vmem [resolvable:$true] %s31_s30 }
  0x16   :  { %p322_p9 = scmp.lt.u32.totalorder %s318_s7, %s526_s1 }
  0x18   :  { %p324_p10 = pnand %p322_p9, %p319_p8 }
  0x1a   :  { %327 = shalt.err (!%p324_p10)
}
  0x1b   :  { %s328_s12 = scalar_lea.vmem %s32_s30, 1024  ;;  %p333_p12 = scmp.lt.s32.totalorder %s32_s30, %s32_s30 }
  0x1c   :  { %p329_p11 = scmp.ne.s32.totalorder %s32_s30, %s328_s12  ;;  %p334_p13 = scmp.lt.s32.totalorder %s328_s12, %s328_s12 }
  0x1e   :  { %p335_p0 = por %p334_p13, %p333_p12 }
  0x20   :  { %p336_p1 = pnand %p335_p0, %p329_p11 }
  0x22   :  { %339 = shalt.err (!%p336_p1)
}
  0x23   :  { %37 = dma.hbm_to_vmem [thread:$0]  %s526_s1, 1024, %s32_s30, [#allocation6], %s415_s25, %s415_s25, %s416_s26  }
  0x24   :  { %406 = dma.done.wait [#allocation3], 128  }
  0x25   :  { %407 = vsyncadd [#allocation3], 4294967168 }
  0x26   :  { %408 = dma.done.wait [#allocation6], 1024  }
  0x27   :  { %409 = vsyncadd [#allocation6], 4294966272  ;;  %v418_v0 = vmov 0.0   ;;  %vm419_vm0 = vmmov 0   ;;  %v287_v1 = vld [vmem:[#allocation5] sm:$0xff]   ;;  %v288_v2 = vld [vmem:[#allocation5 + $0x8] sm:$0xff]  }
  0x28   :  { %258 = vmatprep.subr.bf16.mxu0 %v418_v0  ;;  %274 = vmatprep.mubr.msk.bf16.mxu0 %vm419_vm0, %v418_v0  ;;  %v289_v3 = vld [vmem:[#allocation5 + $0x10] sm:$0xff]   ;;  %v290_v4 = vld [vmem:[#allocation5 + $0x18] sm:$0xff]   ;;  %v291_v5 = vld [vmem:[#allocation5 + $0x20] sm:$0xff]   ;;  %s420_s1 = smov [#allocation7]  }
  0x29   :  { %259 = vmatpush3.bf16.msra.mxu0 %v287_v1  ;;  %v292_v6 = vld [vmem:[#allocation5 + $0x28] sm:$0xff]   ;;  %v293_v7 = vld [vmem:[#allocation5 + $0x30] sm:$0xff]   ;;  %v294_v8 = vld [vmem:[#allocation5 + $0x38] sm:$0xff]   ;;  %s191_s14 = sshll.u32 %s420_s1, 4  ;;  %s192_s14 = int_to_ptr.vmem [resolvable:$true] %s191_s14 }
  0x2a   :  { %260 = vmatprep.subr.bf16.mxu0 %v418_v0  ;;  %v295_v9 = vld [vmem:[#allocation2] sm:$0xff]   ;;  %s340_s15 = scalar_lea.vmem %s192_s14, 128  ;;  %p345_p3 = scmp.lt.s32.totalorder %s192_s14, %s192_s14 }
  0x2b   :  { %p341_p2 = scmp.ne.s32.totalorder %s192_s14, %s340_s15  ;;  %p346_p4 = scmp.lt.s32.totalorder %s340_s15, %s340_s15 }
  0x2d   :  { %261 = vmatpush3.bf16.msra.mxu0 %v288_v2  ;;  %p347_p5 = por %p346_p4, %p345_p3 }
  0x2e   :  { %262 = vmatprep.subr.bf16.mxu0 %v418_v0 }
  0x2f   :  { %p348_p6 = pnand %p347_p5, %p341_p2 }
  0x31   :  { %263 = vmatpush3.bf16.msra.mxu0 %v289_v3 }
  0x32   :  { %264 = vmatprep.subr.bf16.mxu0 %v418_v0 }
  0x35   :  { %265 = vmatpush3.bf16.msra.mxu0 %v290_v4 }
  0x36   :  { %266 = vmatprep.subr.bf16.mxu0 %v418_v0 }
  0x39   :  { %267 = vmatpush3.bf16.msra.mxu0 %v291_v5 }
  0x3a   :  { %268 = vmatprep.subr.bf16.mxu0 %v418_v0 }
  0x3d   :  { %269 = vmatpush3.bf16.msra.mxu0 %v292_v6 }
  0x3e   :  { %270 = vmatprep.subr.bf16.mxu0 %v418_v0 }
  0x41   :  { %271 = vmatpush3.bf16.msra.mxu0 %v293_v7 }
  0x42   :  { %272 = vmatprep.subr.bf16.mxu0 %v418_v0 }
  0x45   :  { %273 = vmatpush3.bf16.msra.mxu0 %v294_v8 }
  0x48   :  { %275 = vmatmul.mubr.bf16.vlgmr.msra.gmra.mrb[0].mxu0 %v295_v9 }
 0x11b   :  { %v151_v10 = vpop.f32.mrb[0].mxu0 }
 0x11c   :  { %v276_v11 = vpop.f32.mrb[1].mxu0  ;;  %v176_v13 = vmul.f32 %v151_v10, %v151_v10 }
 0x11d   :  { %v154_v12 = vpop.f32.mrb[2].mxu0 }
 0x11e   :  { %v247_v14 = vpack.c.bf16 %v154_v12, %v151_v10  ;;  %v168_v15 = vadd.f32 %v154_v12, %v151_v10  ;;  %v177_v16 = vmul.f32 %v154_v12, %v154_v12  ;;  %v277_v17 = vpop.f32.mrb[3].mxu0 }
 0x120   :  { %v169_v18 = vrot.slane %v168_v15, 4  ;;  %v178_v19 = vadd.f32 %v177_v16, %v176_v13  ;;  %248 = vst [vmem:[#allocation7] sm:$0xff] %v247_v14  }
 0x121   :  { %351 = shalt.err (!%p348_p6)
}
 0x122   :  { %s352_s18 = scalar_lea.hbm %s527_s2, 128 }
 0x123   :  { %p353_p7 = scmp.ne.s32.totalorder %s527_s2, %s352_s18  ;;  %p356_p8 = scmp.lt.u32.totalorder %s352_s18, %s527_s2 }
 0x125   :  { %p358_p9 = pnand %p356_p8, %p353_p7 }
 0x127   :  { %361 = shalt.err (!%p358_p9)
}
 0x128   :  { %197 = dma.vmem_to_hbm [thread:$0]  %s192_s14, 128, %s527_s2, [#allocation4], %s415_s25, %s415_s25, %s416_s26   ;;  %v170_v20 = vadd.f32 %v169_v18, %v168_v15  ;;  %v179_v21 = vrot.slane %v178_v19, 4 }
 0x129   :  { %s421_s27 = smov [#allocation8]   ;;  %s422_s29 = smov [#allocation10]  }
 0x12a   :  { %v171_v22 = vrot.slane %v170_v20, 2  ;;  %v180_v23 = vadd.f32 %v179_v21, %v178_v19  ;;  %s204_s28 = sshll.u32 %s421_s27, 4  ;;  %s214_s30 = sshll.u32 %s422_s29, 4  ;;  %s205_s28 = int_to_ptr.vmem [resolvable:$true] %s204_s28  ;;  %s493_s30 = int_to_ptr.vmem [resolvable:$true] %s214_s30 }
 0x12b   :  { %s362_s2 = scalar_lea.vmem %s205_s28, 16  ;;  %s366_s25 = scalar_lea.vmem %s205_s28, 32 }
 0x12c   :  { %v172_v24 = vadd.f32 %v171_v22, %v170_v20  ;;  %v181_v25 = vrot.slane %v180_v23, 2  ;;  %p363_p10 = scmp.ne.s32.totalorder %s205_s28, %s362_s2  ;;  %p367_p11 = scmp.lt.s32.totalorder %s205_s28, %s205_s28 }
 0x12d   :  { %p368_p12 = scmp.lt.s32.totalorder %s366_s25, %s362_s2 }
 0x12e   :  { %v173_v26 = vrot.slane %v172_v24, 1  ;;  %v182_v27 = vadd.f32 %v181_v25, %v180_v23 }
 0x12f   :  { %p369_p13 = por %p368_p12, %p367_p11 }
 0x130   :  { %v174_v28 = vadd.f32 %v173_v26, %v172_v24  ;;  %v183_v29 = vrot.slane %v182_v27, 1 }
 0x131   :  { %p370_p0 = pnand %p369_p13, %p363_p10 }
 0x132   :  { %175 = vst [vmem:[#allocation8] sm:$0x1] %v174_v28  ;;  %v184_v30 = vadd.f32 %v183_v29, %v182_v27 }
 0x133   :  { %373 = shalt.err (!%p370_p0)
}
 0x134   :  { %s374_s6 = scalar_lea.hbm %s528_s3, 16 }
 0x135   :  { %p375_p1 = scmp.ne.s32.totalorder %s528_s3, %s374_s6  ;;  %p378_p2 = scmp.lt.u32.totalorder %s374_s6, %s528_s3 }
 0x137   :  { %p380_p3 = pnand %p378_p2, %p375_p1 }
 0x139   :  { %383 = shalt.err (!%p380_p3)
}
 0x13a   :  { %207 = dma.vmem_to_hbm [thread:$0]  %s205_s28, 16, %s528_s3, [#allocation9]   ;;  %185 = vst [vmem:[#allocation10] sm:$0x1] %v184_v30 }
 0x13b   :  { %s384_s0 = scalar_lea.vmem %s493_s30, 16  ;;  %s388_s13 = scalar_lea.vmem %s493_s30, 32 }
 0x13c   :  { %p385_p4 = scmp.ne.s32.totalorder %s493_s30, %s384_s0  ;;  %p389_p5 = scmp.lt.s32.totalorder %s493_s30, %s493_s30 }
 0x13d   :  { %p390_p6 = scmp.lt.s32.totalorder %s388_s13, %s384_s0 }
 0x13f   :  { %p391_p7 = por %p390_p6, %p389_p5 }
 0x141   :  { %p392_p8 = pnand %p391_p7, %p385_p4 }
 0x143   :  { %395 = shalt.err (!%p392_p8)
}
 0x144   :  { %s396_s15 = scalar_lea.hbm %s529_s4, 16 }
 0x145   :  { %p397_p9 = scmp.ne.s32.totalorder %s529_s4, %s396_s15  ;;  %p400_p10 = scmp.lt.u32.totalorder %s396_s15, %s529_s4 }
 0x147   :  { %p402_p11 = pnand %p400_p10, %p397_p9 }
 0x149   :  { %405 = shalt.err (!%p402_p11)
}
 0x14a   :  { %217 = dma.vmem_to_hbm [thread:$0]  %s493_s30, 16, %s529_s4, [#allocation9]  }
 0x14b   :  { %410 = dma.done.wait [#allocation4], 128  }
 0x14c   :  { %411 = vsyncadd [#allocation4], 4294967168 }
 0x14d   :  { %412 = dma.done.wait [#allocation9], 32  }
 0x14e   :  { %413 = vsyncadd [#allocation9], 4294967264 }
 0x14f   :  { %227 = vsyncpa [#allocation3], 1 }
 0x150   :  { %228 = vsyncpa [#allocation6], 1 }
 0x151   :  { %229 = vsyncpa [#allocation4], 1 }
 0x152   :  { %230 = vsyncpa [#allocation9], 1 }

</bundles_post_ra>
